<compile_context>
chip_gen: v7x
topology: tpu7x:2x2x1
jax: 0.10.0
libtpu: 0.0.40
codegen_flags: <defaults>
</compile_context>

<pallas_src>
import jax
import jax.numpy as jnp
from jax.experimental import pallas as pl
from jax.experimental.pallas import tpu as pltpu


def _fold_params(params, D, H):
    """Wrapper-side (plain jnp) folding of the seq-len-1 attention projections into
    the first fusion Linear. Returns the packed kernel weight set."""
    f32, bf16 = jnp.float32, jnp.bfloat16
    wf1, bf1 = params["wf1"], params["bf1"]                    # (3D, 2H), (1, 2H)

    # attn(value) == value @ (Wv @ Wo) + (bv @ Wo + bo)   (softmax over one key == 1)
    Av = params["wv_tv"] @ params["wo_tv"]
    cv = params["bv_tv"] @ params["wo_tv"] + params["bo_tv"]
    At = params["wv_vt"] @ params["wo_vt"]
    ct = params["bv_vt"] @ params["wo_vt"] + params["bo_vt"]

    w_s, w_v, w_t = wf1[0:D, :], wf1[D:2 * D, :], wf1[2 * D:3 * D, :]
    w_fuse = jnp.concatenate([w_s, Av @ w_v, At @ w_t], axis=0).astype(bf16)   # (3D, 2H)
    b_fuse = (bf1 + cv @ w_v + ct @ w_t).astype(f32)                           # (1, 2H)

    wf2 = params["wf2"].astype(bf16)                                           # (2H, H)
    wp = jnp.stack([params["wp1"], params["wp2"]]).astype(bf16)                # (2, H, H)
    vecs = jnp.concatenate(                                                    # (5, H)
        [params["bf2"], params["ln_g"], params["ln_b"], params["bp1"], params["bp2"]],
        axis=0).astype(f32)
    return w_fuse, b_fuse, wf2, wp, vecs


def modality_alignment(spatial, text, vision, params, *, tile_n=None):
    N, D = spatial.shape
    H = params["ln_g"].shape[1]

    if tile_n is None:
        # Toy sizes: one grid step.  Large N: biggest MXU-friendly divisor.
        tile_n = N if N <= 512 else next(
            (t for t in (512, 256, 128, 64, 32, 16, 8) if N % t == 0), N)
    assert N % tile_n == 0
    assert tile_n == N or tile_n % 8 == 0

    OUT_W = max(128, pl.cdiv(2 * H, 128) * 128)   # lane-dense packed output width
    PAD = OUT_W - 2 * H

    w_fuse, b_fuse, wf2, wp, vecs = _fold_params(params, D, H)
    f32, bf16 = jnp.float32, jnp.bfloat16

    def kernel(sp_ref, vi_ref, tx_ref, wfuse_ref, bfuse_ref, wf2_ref, wp_ref,
               vec_ref, out_ref):
        sp = sp_ref[...].astype(bf16)
        vi = vi_ref[...].astype(bf16)
        tx = tx_ref[...].astype(bf16)

        # Folded attention + fusion Linear: three K=D slice-dots sharing one f32 acc.
        h = (jnp.dot(sp, wfuse_ref[0:D, :], preferred_element_type=f32)
             + jnp.dot(vi, wfuse_ref[D:2 * D, :], preferred_element_type=f32)
             + jnp.dot(tx, wfuse_ref[2 * D:3 * D, :], preferred_element_type=f32)
             + bfuse_ref[...])
        h = jnp.maximum(h, 0.0)                  # ReLU; Dropout(0.1) = identity (eval)
        h = (jnp.dot(h.astype(bf16), wf2_ref[...], preferred_element_type=f32)
             + vec_ref[0:1, :])                  # + bf2

        # LayerNorm(hidden_dim), eps = 1e-5 (f32 math).
        mean = jnp.mean(h, axis=-1, keepdims=True)
        var = jnp.mean(jnp.square(h - mean), axis=-1, keepdims=True)
        aligned = ((h - mean) * jax.lax.rsqrt(var + 1e-5)
                   * vec_ref[1:2, :] + vec_ref[2:3, :])       # * ln_g + ln_b

        # projection_head: Linear -> ReLU -> Linear.
        p = jnp.maximum(
            jnp.dot(aligned.astype(bf16), wp_ref[0], preferred_element_type=f32)
            + vec_ref[3:4, :], 0.0)
        proj = (jnp.dot(p.astype(bf16), wp_ref[1], preferred_element_type=f32)
                + vec_ref[4:5, :])

        # Single lane-dense store: [aligned | proj | zero pad] -> (tile_n, OUT_W).
        pieces = [aligned, proj]
        if PAD:
            pieces.append(jnp.zeros((aligned.shape[0], PAD), f32))
        out_ref[...] = jnp.concatenate(pieces, axis=1).astype(out_ref.dtype)

    weights = (w_fuse, b_fuse, wf2, wp, vecs)

    def row_spec(d):
        return pl.BlockSpec((tile_n, d), lambda i: (i, 0))

    def full_spec(a):
        # Constant block index -> DMA'd once.  (When scaling the model on v7x's
        # 64 MiB VMEM, add pipeline_mode=pl.Buffered(1) so weights are not
        # double-buffered and spend the headroom on a larger row tile.)
        return pl.BlockSpec(a.shape, lambda i: (0,) * a.ndim)

    packed = pl.pallas_call(
        kernel,
        out_shape=jax.ShapeDtypeStruct((N, OUT_W), spatial.dtype),
        grid_spec=pltpu.PrefetchScalarGridSpec(
            num_scalar_prefetch=0,
            grid=(N // tile_n,),
            in_specs=[row_spec(D), row_spec(D), row_spec(D)]
                     + [full_spec(w) for w in weights],
            out_specs=row_spec(OUT_W),
        ),
        compiler_params=pltpu.CompilerParams(dimension_semantics=("parallel",)),
    )(spatial, vision, text, *weights)   # order matches the folded weight blocks

    return packed[:, :H], packed[:, H:2 * H]


def reference(spatial, text, vision, p):
    """Pure-JAX (unfolded, f32) reference of the same forward pass."""
    tv = vision @ p["wv_tv"] + p["bv_tv"]
    tv = tv @ p["wo_tv"] + p["bo_tv"]
    vt = text @ p["wv_vt"] + p["bv_vt"]
    vt = vt @ p["wo_vt"] + p["bo_vt"]
    comb = jnp.concatenate([spatial, tv, vt], axis=1)
    h = jnp.maximum(comb @ p["wf1"] + p["bf1"], 0.0)
    h = h @ p["wf2"] + p["bf2"]
    mean = h.mean(-1, keepdims=True)
    var = ((h - mean) ** 2).mean(-1, keepdims=True)
    aligned = (h - mean) / jnp.sqrt(var + 1e-5) * p["ln_g"] + p["ln_b"]
    proj = jnp.maximum(aligned @ p["wp1"] + p["bp1"], 0.0) @ p["wp2"] + p["bp2"]
    return aligned, proj


def init_params(key, feature_dim, hidden_dim):
    D, H = feature_dim, hidden_dim
    ks = iter(jax.random.split(key, 32))

    def w(shape, scale=0.05):
        return (scale * jax.random.normal(next(ks), shape)).astype(jnp.float32)

    params = {
        # v-projection + out-projection of the two (used) MultiheadAttention modules
        "wv_tv": w((D, D)), "bv_tv": w((1, D)),
        "wo_tv": w((D, D)), "bo_tv": w((1, D)),
        "wv_vt": w((D, D)), "bv_vt": w((1, D)),
        "wo_vt": w((D, D)), "bo_vt": w((1, D)),
        # fusion_layer
        "wf1": w((3 * D, 2 * H)), "bf1": w((1, 2 * H)),
        "wf2": w((2 * H, H)), "bf2": w((1, H)),
        "ln_g": jnp.ones((1, H), jnp.float32), "ln_b": jnp.zeros((1, H), jnp.float32),
        # projection_head
        "wp1": w((H, H)), "bp1": w((1, H)),
        "wp2": w((H, H)), "bp2": w((1, H)),
    }
    return params


if __name__ == "__main__":
    # Small shapes consistent with the module: feature_dim=64 (8 heads x 8),
    # hidden_dim=32, N=16 rows.
    N, D, H = 16, 64, 32
    key = jax.random.PRNGKey(0)
    k_sp, k_tx, k_vi, k_p = jax.random.split(key, 4)

    spatial = jax.random.normal(k_sp, (N, D), jnp.float32)
    text = jax.random.normal(k_tx, (N, D), jnp.float32)
    vision = jax.random.normal(k_vi, (N, D), jnp.float32)
    params = init_params(k_p, D, H)

    aligned, proj = modality_alignment(spatial, text, vision, params)  # grid=(1,)
    jax.block_until_ready((aligned, proj))

    aligned_ref, proj_ref = reference(spatial, text, vision, params)
    assert aligned.shape == (N, H) and proj.shape == (N, H)
    assert jnp.allclose(aligned, aligned_ref, rtol=5e-2, atol=5e-2)
    assert jnp.allclose(proj, proj_ref, rtol=5e-2, atol=5e-2)

    print("KERNEL_OK")
</pallas_src>

<mosaic_0001>
module attributes {stable_mosaic.version = 11 : i64} {
  func.func @kernel(%arg0: i32, %arg1: memref<16x64xf32, #tpu.memory_space<vmem>>, %arg2: memref<16x64xf32, #tpu.memory_space<vmem>>, %arg3: memref<16x64xf32, #tpu.memory_space<vmem>>, %arg4: memref<192x64xbf16, #tpu.memory_space<vmem>>, %arg5: memref<1x64xf32, #tpu.memory_space<vmem>>, %arg6: memref<64x32xbf16, #tpu.memory_space<vmem>>, %arg7: memref<2x32x32xbf16, #tpu.memory_space<vmem>>, %arg8: memref<5x32xf32, #tpu.memory_space<vmem>>, %arg9: memref<16x128xf32, #tpu.memory_space<vmem>>) attributes {dimension_semantics = [#tpu.dimension_semantics<parallel>], iteration_bounds = array<i64: 1>, scalar_prefetch = 0 : i64, scratch_operands = 0 : i64, tpu.core_type = #tpu.core_type<tc>, window_params = [{transform_indices = @transform_0, window_bounds = array<i64: 16, 64>}, {transform_indices = @transform_1, window_bounds = array<i64: 16, 64>}, {transform_indices = @transform_2, window_bounds = array<i64: 16, 64>}, {pipeline_mode = #tpu.pipeline_mode<synchronous>, transform_indices = @transform_3, window_bounds = array<i64: 192, 64>}, {pipeline_mode = #tpu.pipeline_mode<synchronous>, transform_indices = @transform_4, window_bounds = array<i64: 1, 64>}, {pipeline_mode = #tpu.pipeline_mode<synchronous>, transform_indices = @transform_5, window_bounds = array<i64: 64, 32>}, {pipeline_mode = #tpu.pipeline_mode<synchronous>, transform_indices = @transform_6, window_bounds = array<i64: 2, 32, 32>}, {pipeline_mode = #tpu.pipeline_mode<synchronous>, transform_indices = @transform_7, window_bounds = array<i64: 5, 32>}, {transform_indices = @transform_8, window_bounds = array<i64: 16, 128>}]} {
    %c0 = arith.constant 0 : index
    %c0_0 = arith.constant 0 : index
    %0 = vector.load %arg1[%c0, %c0_0] : memref<16x64xf32, #tpu.memory_space<vmem>>, vector<16x64xf32>
    %1 = arith.truncf %0 : vector<16x64xf32> to vector<16x64xbf16>
    %c0_1 = arith.constant 0 : index
    %c0_2 = arith.constant 0 : index
    %2 = vector.load %arg2[%c0_1, %c0_2] : memref<16x64xf32, #tpu.memory_space<vmem>>, vector<16x64xf32>
    %3 = arith.truncf %2 : vector<16x64xf32> to vector<16x64xbf16>
    %c0_3 = arith.constant 0 : index
    %c0_4 = arith.constant 0 : index
    %4 = vector.load %arg3[%c0_3, %c0_4] : memref<16x64xf32, #tpu.memory_space<vmem>>, vector<16x64xf32>
    %5 = arith.truncf %4 : vector<16x64xf32> to vector<16x64xbf16>
    %c0_5 = arith.constant 0 : index
    %c0_6 = arith.constant 0 : index
    %6 = vector.load %arg4[%c0_5, %c0_6] : memref<192x64xbf16, #tpu.memory_space<vmem>>, vector<64x64xbf16>
    %cst = arith.constant dense<0.000000e+00> : vector<16x64xf32>
    %7 = tpu.matmul %1, %6, %cst {dimension_numbers = #tpu.dot_dimension_numbers<[1], [0], [0], [1], [0, 0, 1, 1], [], []>} : vector<16x64xbf16>, vector<64x64xbf16>, vector<16x64xf32> -> vector<16x64xf32>
    %c64 = arith.constant 64 : index
    %c0_7 = arith.constant 0 : index
    %8 = vector.load %arg4[%c64, %c0_7] : memref<192x64xbf16, #tpu.memory_space<vmem>>, vector<64x64xbf16>
    %cst_8 = arith.constant dense<0.000000e+00> : vector<16x64xf32>
    %9 = tpu.matmul %3, %8, %cst_8 {dimension_numbers = #tpu.dot_dimension_numbers<[1], [0], [0], [1], [0, 0, 1, 1], [], []>} : vector<16x64xbf16>, vector<64x64xbf16>, vector<16x64xf32> -> vector<16x64xf32>
    %10 = arith.addf %7, %9 : vector<16x64xf32>
    %c128 = arith.constant 128 : index
    %c0_9 = arith.constant 0 : index
    %11 = vector.load %arg4[%c128, %c0_9] : memref<192x64xbf16, #tpu.memory_space<vmem>>, vector<64x64xbf16>
    %cst_10 = arith.constant dense<0.000000e+00> : vector<16x64xf32>
    %12 = tpu.matmul %5, %11, %cst_10 {dimension_numbers = #tpu.dot_dimension_numbers<[1], [0], [0], [1], [0, 0, 1, 1], [], []>} : vector<16x64xbf16>, vector<64x64xbf16>, vector<16x64xf32> -> vector<16x64xf32>
    %13 = arith.addf %10, %12 : vector<16x64xf32>
    %c0_11 = arith.constant 0 : index
    %c0_12 = arith.constant 0 : index
    %14 = vector.load %arg5[%c0_11, %c0_12] : memref<1x64xf32, #tpu.memory_space<vmem>>, vector<1x64xf32>
    %15 = vector.broadcast %14 : vector<1x64xf32> to vector<16x64xf32>
    %16 = arith.addf %13, %15 : vector<16x64xf32>
    %cst_13 = arith.constant 0.000000e+00 : f32
    %17 = vector.broadcast %cst_13 : f32 to vector<16x64xf32>
    %18 = arith.maximumf %16, %17 : vector<16x64xf32>
    %19 = arith.truncf %18 : vector<16x64xf32> to vector<16x64xbf16>
    %c0_14 = arith.constant 0 : index
    %c0_15 = arith.constant 0 : index
    %20 = vector.load %arg6[%c0_14, %c0_15] : memref<64x32xbf16, #tpu.memory_space<vmem>>, vector<64x32xbf16>
    %cst_16 = arith.constant dense<0.000000e+00> : vector<16x32xf32>
    %21 = tpu.matmul %19, %20, %cst_16 {dimension_numbers = #tpu.dot_dimension_numbers<[1], [0], [0], [1], [0, 0, 1, 1], [], []>} : vector<16x64xbf16>, vector<64x32xbf16>, vector<16x32xf32> -> vector<16x32xf32>
    %c0_17 = arith.constant 0 : index
    %c0_18 = arith.constant 0 : index
    %22 = vector.load %arg8[%c0_17, %c0_18] : memref<5x32xf32, #tpu.memory_space<vmem>>, vector<1x32xf32>
    %23 = vector.broadcast %22 : vector<1x32xf32> to vector<16x32xf32>
    %24 = arith.addf %21, %23 : vector<16x32xf32>
    %cst_19 = arith.constant dense<0.000000e+00> : vector<16xf32>
    %25 = vector.multi_reduction <add>, %24, %cst_19 [1] : vector<16x32xf32> to vector<16xf32>
    %26 = vector.shape_cast %25 : vector<16xf32> to vector<16x1xf32>
    %cst_20 = arith.constant 3.200000e+01 : f32
    %27 = vector.broadcast %cst_20 : f32 to vector<16x1xf32>
    %28 = arith.divf %26, %27 : vector<16x1xf32>
    %29 = vector.broadcast %28 : vector<16x1xf32> to vector<16x32xf32>
    %30 = arith.subf %24, %29 : vector<16x32xf32>
    %31 = arith.mulf %30, %30 : vector<16x32xf32>
    %cst_21 = arith.constant dense<0.000000e+00> : vector<16xf32>
    %32 = vector.multi_reduction <add>, %31, %cst_21 [1] : vector<16x32xf32> to vector<16xf32>
    %33 = vector.shape_cast %32 : vector<16xf32> to vector<16x1xf32>
    %cst_22 = arith.constant 3.200000e+01 : f32
    %34 = vector.broadcast %cst_22 : f32 to vector<16x1xf32>
    %35 = arith.divf %33, %34 : vector<16x1xf32>
    %36 = vector.broadcast %28 : vector<16x1xf32> to vector<16x32xf32>
    %37 = arith.subf %24, %36 : vector<16x32xf32>
    %cst_23 = arith.constant 9.99999974E-6 : f32
    %38 = vector.broadcast %cst_23 : f32 to vector<16x1xf32>
    %39 = arith.addf %35, %38 : vector<16x1xf32>
    %40 = math.rsqrt %39 : vector<16x1xf32>
    %41 = vector.broadcast %40 : vector<16x1xf32> to vector<16x32xf32>
    %42 = arith.mulf %37, %41 : vector<16x32xf32>
    %c1 = arith.constant 1 : index
    %c0_24 = arith.constant 0 : index
    %43 = vector.load %arg8[%c1, %c0_24] : memref<5x32xf32, #tpu.memory_space<vmem>>, vector<1x32xf32>
    %44 = vector.broadcast %43 : vector<1x32xf32> to vector<16x32xf32>
    %45 = arith.mulf %42, %44 : vector<16x32xf32>
    %c2 = arith.constant 2 : index
    %c0_25 = arith.constant 0 : index
    %46 = vector.load %arg8[%c2, %c0_25] : memref<5x32xf32, #tpu.memory_space<vmem>>, vector<1x32xf32>
    %47 = vector.broadcast %46 : vector<1x32xf32> to vector<16x32xf32>
    %48 = arith.addf %45, %47 : vector<16x32xf32>
    %49 = arith.truncf %48 : vector<16x32xf32> to vector<16x32xbf16>
    %c0_26 = arith.constant 0 : index
    %c0_27 = arith.constant 0 : index
    %c0_28 = arith.constant 0 : index
    %50 = vector.load %arg7[%c0_26, %c0_27, %c0_28] : memref<2x32x32xbf16, #tpu.memory_space<vmem>>, vector<1x32x32xbf16>
    %51 = vector.shape_cast %50 : vector<1x32x32xbf16> to vector<32x32xbf16>
    %cst_29 = arith.constant dense<0.000000e+00> : vector<16x32xf32>
    %52 = tpu.matmul %49, %51, %cst_29 {dimension_numbers = #tpu.dot_dimension_numbers<[1], [0], [0], [1], [0, 0, 1, 1], [], []>} : vector<16x32xbf16>, vector<32x32xbf16>, vector<16x32xf32> -> vector<16x32xf32>
    %c3 = arith.constant 3 : index
    %c0_30 = arith.constant 0 : index
    %53 = vector.load %arg8[%c3, %c0_30] : memref<5x32xf32, #tpu.memory_space<vmem>>, vector<1x32xf32>
    %54 = vector.broadcast %53 : vector<1x32xf32> to vector<16x32xf32>
    %55 = arith.addf %52, %54 : vector<16x32xf32>
    %cst_31 = arith.constant 0.000000e+00 : f32
    %56 = vector.broadcast %cst_31 : f32 to vector<16x32xf32>
    %57 = arith.maximumf %55, %56 : vector<16x32xf32>
    %58 = arith.truncf %57 : vector<16x32xf32> to vector<16x32xbf16>
    %c1_32 = arith.constant 1 : index
    %c0_33 = arith.constant 0 : index
    %c0_34 = arith.constant 0 : index
    %59 = vector.load %arg7[%c1_32, %c0_33, %c0_34] : memref<2x32x32xbf16, #tpu.memory_space<vmem>>, vector<1x32x32xbf16>
    %60 = vector.shape_cast %59 : vector<1x32x32xbf16> to vector<32x32xbf16>
    %cst_35 = arith.constant dense<0.000000e+00> : vector<16x32xf32>
    %61 = tpu.matmul %58, %60, %cst_35 {dimension_numbers = #tpu.dot_dimension_numbers<[1], [0], [0], [1], [0, 0, 1, 1], [], []>} : vector<16x32xbf16>, vector<32x32xbf16>, vector<16x32xf32> -> vector<16x32xf32>
    %c4 = arith.constant 4 : index
    %c0_36 = arith.constant 0 : index
    %62 = vector.load %arg8[%c4, %c0_36] : memref<5x32xf32, #tpu.memory_space<vmem>>, vector<1x32xf32>
    %63 = vector.broadcast %62 : vector<1x32xf32> to vector<16x32xf32>
    %64 = arith.addf %61, %63 : vector<16x32xf32>
    %cst_37 = arith.constant 0.000000e+00 : f32
    %65 = vector.broadcast %cst_37 : f32 to vector<16x64xf32>
    %66 = tpu.concatenate %48, %64, %65 in 1 : vector<16x32xf32>, vector<16x32xf32>, vector<16x64xf32> -> vector<16x128xf32>
    %c0_38 = arith.constant 0 : index
    %c0_39 = arith.constant 0 : index
    %67 = vector.load %arg9[%c0_38, %c0_39] : memref<16x128xf32, #tpu.memory_space<vmem>>, vector<16x128xf32>
    tpu.vector_store %arg9[%c0_38, %c0_39], %66 {strides = array<i32>} : memref<16x128xf32, #tpu.memory_space<vmem>>, vector<16x128xf32>,
    return
  }
  func.func @transform_0(%arg0: i32) -> (i32, i32) {
    %c0_i32 = arith.constant 0 : i32
    %c0_i32_0 = arith.constant 0 : i32
    return %arg0, %c0_i32 : i32, i32
  }
  func.func @transform_1(%arg0: i32) -> (i32, i32) {
    %c0_i32 = arith.constant 0 : i32
    %c0_i32_0 = arith.constant 0 : i32
    return %arg0, %c0_i32 : i32, i32
  }
  func.func @transform_2(%arg0: i32) -> (i32, i32) {
    %c0_i32 = arith.constant 0 : i32
    %c0_i32_0 = arith.constant 0 : i32
    return %arg0, %c0_i32 : i32, i32
  }
  func.func @transform_3(%arg0: i32) -> (i32, i32) {
    %c0_i32 = arith.constant 0 : i32
    %c0_i32_0 = arith.constant 0 : i32
    %c0_i32_1 = arith.constant 0 : i32
    return %c0_i32, %c0_i32_0 : i32, i32
  }
  func.func @transform_4(%arg0: i32) -> (i32, i32) {
    %c0_i32 = arith.constant 0 : i32
    %c0_i32_0 = arith.constant 0 : i32
    %c0_i32_1 = arith.constant 0 : i32
    return %c0_i32, %c0_i32_0 : i32, i32
  }
  func.func @transform_5(%arg0: i32) -> (i32, i32) {
    %c0_i32 = arith.constant 0 : i32
    %c0_i32_0 = arith.constant 0 : i32
    %c0_i32_1 = arith.constant 0 : i32
    return %c0_i32, %c0_i32_0 : i32, i32
  }
  func.func @transform_6(%arg0: i32) -> (i32, i32, i32) {
    %c0_i32 = arith.constant 0 : i32
    %c0_i32_0 = arith.constant 0 : i32
    %c0_i32_1 = arith.constant 0 : i32
    %c0_i32_2 = arith.constant 0 : i32
    return %c0_i32, %c0_i32_0, %c0_i32_1 : i32, i32, i32
  }
  func.func @transform_7(%arg0: i32) -> (i32, i32) {
    %c0_i32 = arith.constant 0 : i32
    %c0_i32_0 = arith.constant 0 : i32
    %c0_i32_1 = arith.constant 0 : i32
    return %c0_i32, %c0_i32_0 : i32, i32
  }
  func.func @transform_8(%arg0: i32) -> (i32, i32) {
    %c0_i32 = arith.constant 0 : i32
    %c0_i32_0 = arith.constant 0 : i32
    return %arg0, %c0_i32 : i32, i32
  }
}

</mosaic_0001>

<bundles_post_ra>
// kernel: tpu_custom_call.1
= control target key start
LH: loop header
LB: loop body
LE: loop exit
PB: predicated region body
PF: predicated region fallthrough
CT: control target
= control target key end

     0   :  { %v751_v1 = vmov 0.0   ;;  %vm752_vm0 = vmmov 0   ;;  %vm80_vm1 = vcmask 523264   ;;  %s956_s0 = inlined_call_operand.vmem [shape: f32[16,64], index: 0, kind: input, shape index: {}]   ;;  %s957_s1 = inlined_call_operand.vmem [shape: f32[16,64], index: 1, kind: input, shape index: {}]   ;;  %s958_s2 = inlined_call_operand.vmem [shape: f32[16,64], index: 2, kind: input, shape index: {}]   ;;  %s959_s3 = inlined_call_operand.vmem [shape: bf16[192,64], index: 3, kind: input, shape index: {}]   ;;  %s960_s4 = inlined_call_operand.vmem [shape: f32[1,64], index: 4, kind: input, shape index: {}]   ;;  %s961_s5 = inlined_call_operand.vmem [shape: bf16[64,32], index: 5, kind: input, shape index: {}]   ;;  %s962_s6 = inlined_call_operand.vmem [shape: bf16[2,32,32], index: 6, kind: input, shape index: {}]   ;;  %s963_s7 = inlined_call_operand.vmem [shape: f32[5,32], index: 7, kind: input, shape index: {}]   ;;  %s964_s8 = inlined_call_operand.hbm [shape: f32[16,128], index: 8, kind: output, shape index: {}]  }
   0x1   :  { %v703_v0 = vld [vmem:[%s959_s3 + $0x20] sm:$0xff]   ;;  %633 = vmatprep.subr.bf16.mxu0 %v751_v1  ;;  %645 = vmatprep.subr.bf16.mxu1 %v751_v1  ;;  %v705_v3 = vld [vmem:[%s959_s3 + $0x28] sm:$0xff]   ;;  %v707_v5 = vld [vmem:[%s959_s3 + $0x30] sm:$0xff]  }
   0x2   :  { %v704_v2 = vld [vmem:[%s959_s3] sm:$0xff]   ;;  %634 = vmatpush3.bf16.msra.mxu0 %v703_v0  ;;  %641 = vmatprep.mubr.msk.bf16.mxu0 %vm752_vm0, %v751_v1  ;;  %v706_v4 = vld [vmem:[%s959_s3 + $0x8] sm:$0xff]   ;;  %v708_v6 = vld [vmem:[%s959_s3 + $0x10] sm:$0xff]  }
   0x3   :  { %646 = vmatpush3.bf16.msra.mxu1 %v704_v2  ;;  %635 = vmatprep.subr.bf16.mxu0 %v751_v1  ;;  %v709_v7 = vld [vmem:[%s959_s3 + $0x38] sm:$0xff]   ;;  %v34_v8 = vld [vmem:[%s957_s1] sm:$0xff]  ;;  %v35_v10 = vld [vmem:[%s957_s1 + $0x8] sm:$0xff] }
   0x4   :  { %647 = vmatprep.subr.bf16.mxu1 %v751_v1  ;;  %653 = vmatprep.mubr.msk.bf16.mxu1 %vm752_vm0, %v751_v1  ;;  %v710_v9 = vld [vmem:[%s959_s3 + $0x18] sm:$0xff]   ;;  %v31_v11 = vld [vmem:[%s956_s0] sm:$0xff]  ;;  %v32_v12 = vld [vmem:[%s956_s0 + $0x8] sm:$0xff]  ;;  %v36_v13 = vpack.c.bf16 %v35_v10, %v34_v8 }
   0x5   :  { %v711_v14 = vld [vmem:[%s959_s3 + $0x40] sm:$0xff]   ;;  %v33_v15 = vpack.c.bf16 %v32_v12, %v31_v11  ;;  %v712_v16 = vld [vmem:[%s959_s3 + $0x48] sm:$0xff]  }
   0x6   :  { %636 = vmatpush3.bf16.msra.mxu0 %v705_v3 }
   0x7   :  { %648 = vmatpush3.bf16.msra.mxu1 %v706_v4  ;;  %637 = vmatprep.subr.bf16.mxu0 %v751_v1 }
   0x8   :  { %649 = vmatprep.subr.bf16.mxu1 %v751_v1 }
   0xa   :  { %638 = vmatpush3.bf16.msra.mxu0 %v707_v5 }
   0xb   :  { %650 = vmatpush3.bf16.msra.mxu1 %v708_v6  ;;  %639 = vmatprep.subr.bf16.mxu0 %v751_v1 }
   0xc   :  { %651 = vmatprep.subr.bf16.mxu1 %v751_v1 }
   0xe   :  { %640 = vmatpush3.bf16.msra.mxu0 %v709_v7 }
   0xf   :  { %652 = vmatpush3.bf16.msra.mxu1 %v710_v9  ;;  %657 = vmatprep.subr.bf16.mxu0 %v751_v1 }
  0x10   :  { %669 = vmatprep.subr.bf16.mxu1 %v751_v1 }
  0x11   :  { %642 = vmatmul.mubr.msk.bf16.vlgmr.msra.gmra.mrb[0].mxu0 %vm80_vm1, %v36_v13 }
  0x12   :  { %654 = vmatmul.mubr.msk.bf16.vlgmr.msra.gmra.mrb[0].mxu1 %vm80_vm1, %v33_v15  ;;  %658 = vmatpush3.bf16.msra.mxu0 %v711_v14 }
  0x13   :  { %659 = vmatprep.subr.bf16.mxu0 %v751_v1  ;;  %665 = vmatprep.mubr.msk.bf16.mxu0 %vm752_vm0, %v751_v1 }
  0x14   :  { %13 = vsyncpa [#allocation3], 0  ;;  %677 = vmatprep.mubr.msk.bf16.mxu1 %vm752_vm0, %v751_v1  ;;  %v713_v17 = vld [vmem:[%s959_s3 + $0x50] sm:$0xff]   ;;  %v714_v18 = vld [vmem:[%s959_s3 + $0x58] sm:$0xff]   ;;  %vm364_vm2 = vcmask 261120   ;;  %s754_s3 = smov [#allocation2]  }
  0x15   :  { %v37_v19 = vld [vmem:[%s958_s2] sm:$0xff]  ;;  %v38_v20 = vld [vmem:[%s958_s2 + $0x8] sm:$0xff]  ;;  %v717_v24 = vld [vmem:[%s961_s5 + $0x10] sm:$0xff]   ;;  %s560_s17 = sshll.u32 %s754_s3, 4  ;;  %s561_s17 = int_to_ptr.vmem [resolvable:$true] %s560_s17 }
  0x16   :  { %660 = vmatpush3.bf16.msra.mxu0 %v712_v16  ;;  %v39_v21 = vpack.c.bf16 %v38_v20, %v37_v19  ;;  %v715_v22 = vld [vmem:[%s961_s5] sm:$0xff]   ;;  %v716_v23 = vld [vmem:[%s961_s5 + $0x8] sm:$0xff]   ;;  %v718_v25 = vld [vmem:[%s961_s5 + $0x18] sm:$0xff]   ;;  %p732_p1 = scmp.lt.s32.totalorder %s561_s17, %s561_s17 }
  0x17   :  { %661 = vmatprep.subr.bf16.mxu0 %v751_v1  ;;  %670 = vmatpush3.bf16.msra.mxu1 %v715_v22  ;;  %v586_v37 = vld [vmem:[%s960_s4] ss:$0 sm:$0xff]  ;;  %v720_v5 = vld [vmem:[%s962_s6 + $0x8] sm:$0xff]   ;;  %v593_v14 = vld [vmem:[%s963_s7 + $0x1] ss:$0 sm:$0xff] }
  0x18   :  { %671 = vmatprep.subr.bf16.mxu1 %v751_v1  ;;  %v587_v48 = vld [vmem:[%s963_s7] ss:$0 sm:$0xff] }
  0x19   :  { %v719_v4 = vld [vmem:[%s962_s6] sm:$0xff]  }
  0x1a   :  { %662 = vmatpush3.bf16.msra.mxu0 %v713_v17 }
  0x1b   :  { %663 = vmatprep.subr.bf16.mxu0 %v751_v1  ;;  %672 = vmatpush3.bf16.msra.mxu1 %v716_v23  ;;  %v721_v23 = vld [vmem:[%s962_s6 + $0x10] sm:$0xff]  }
  0x1c   :  { %673 = vmatprep.subr.bf16.mxu1 %v751_v1 }
  0x1e   :  { %664 = vmatpush3.bf16.msra.mxu0 %v714_v18  ;;  %v594_v18 = vld [vmem:[%s963_s7 + $0x2] ss:$0 sm:$0xff] }
  0x1f   :  { %681 = vmatprep.subr.bf16.mxu0 %v751_v1  ;;  %674 = vmatpush3.bf16.msra.mxu1 %v717_v24  ;;  %v722_v24 = vld [vmem:[%s962_s6 + $0x18] sm:$0xff]   ;;  %s753_s6 = smov 32  }
  0x20   :  { %675 = vmatprep.subr.bf16.mxu1 %v751_v1 }
  0x21   :  { %666 = vmatmul.mubr.msk.bf16.vlgmr.msra.gmra.mrb[4].mxu0 %vm80_vm1, %v39_v21 }
  0x22   :  { %685 = vmatprep.mubr.msk.bf16.mxu0 %vm752_vm0, %v751_v1  ;;  %682 = vmatpush3.bf16.msra.mxu0 %v719_v4 }
  0x23   :  { %676 = vmatpush3.bf16.msra.mxu1 %v718_v25  ;;  %683 = vmatprep.subr.bf16.mxu0 %v751_v1  ;;  %v595_v25 = vld [vmem:[%s963_s7 + $0x3] ss:$0 sm:$0xff] }
  0x24   :  { %689 = vmatprep.subr.bf16.mxu1 %v751_v1 }
  0x26   :  { %684 = vmatpush3.bf16.msra.mxu0 %v720_v5 }
  0xe4   :  { %v118_v26 = vpop.f32.mrb[0].mxu0 }
  0xe5   :  { %v186_v27 = vpop.f32.mrb[0].mxu1  ;;  %v643_v28 = vpop.f32.mrb[1].mxu0 }
  0xe6   :  { %v187_v29 = vadd.f32 %v186_v27, %v118_v26  ;;  %v655_v30 = vpop.f32.mrb[1].mxu1  ;;  %v121_v31 = vpop.f32.mrb[2].mxu0 }
  0xe7   :  { %v189_v32 = vpop.f32.mrb[2].mxu1  ;;  %v644_v33 = vpop.f32.mrb[3].mxu0 }
  0xe8   :  { %v190_v34 = vadd.f32 %v189_v32, %v121_v31  ;;  %v656_v35 = vpop.f32.mrb[3].mxu1 }
  0xf4   :  { %v262_v36 = vpop.f32.mrb[4].mxu0 }
  0xf5   :  { %v269_v38 = vadd.f32 %v262_v36, %v187_v29  ;;  %v667_v39 = vpop.f32.mrb[5].mxu0 }
  0xf6   :  { %v265_v40 = vpop.f32.mrb[6].mxu0 }
  0xf7   :  { %v278_v41 = vadd.f32 %v586_v37, %v269_v38  ;;  %v270_v42 = vadd.f32 %v265_v40, %v190_v34  ;;  %v668_v43 = vpop.f32.mrb[7].mxu0 }
  0xf9   :  { %v279_v44 = vadd.f32 %v586_v37, %v270_v42  ;;  %v280_v45 = vmax.f32 %v278_v41, 0.0 }
  0xfb   :  { %v281_v46 = vmax.f32 %v279_v44, 0.0 }
  0xfd   :  { %v282_v47 = vpack.c.bf16 %v281_v46, %v280_v45 }
  0xff   :  { %678 = vmatmul.mubr.msk.bf16.vlgmr.msra.gmra.mrb[4].mxu1 %vm80_vm1, %v282_v47 }
 0x100   :  { %693 = vmatprep.mubr.msk.bf16.mxu1 %vm752_vm0, %v751_v1  ;;  %690 = vmatpush3.bf16.msra.mxu1 %v721_v23 }
 0x101   :  { %691 = vmatprep.subr.bf16.mxu1 %v751_v1  ;;  %v603_v1 = vld [vmem:[%s963_s7 + $0x4] ss:$0 sm:$0xff]  ;;  %s727_s7 = scalar_lea.vmem %s561_s17, 256 }
 0x102   :  { %p728_p0 = scmp.ne.s32.totalorder %s561_s17, %s727_s7  ;;  %p733_p2 = scmp.lt.s32.totalorder %s727_s7, %s727_s7 }
 0x104   :  { %692 = vmatpush3.bf16.msra.mxu1 %v722_v24  ;;  %p734_p3 = por %p733_p2, %p732_p1 }
 0x106   :  { %p735_p4 = pnand %p734_p3, %p728_p0 }
 0x1d2   :  { %v357_v49 = vpop.f32.mrb[4].mxu1 }
 0x1d3   :  { %v358_v50 = vadd.f32 %v587_v48, %v357_v49  ;;  %v679_v51 = vpop.f32.mrb[5].mxu1 }
 0x1d4   :  { %v360_v52 = vpop.f32.mrb[6].mxu1 }
 0x1d5   :  { %v361_v53 = vadd.f32 %v587_v48, %v360_v52  ;;  %v680_v54 = vpop.f32.mrb[7].mxu1  ;;  %v365_v55 = vsel %vm364_vm2, %v358_v50, 0.0 }
 0x1d6   :  { %366 = vadd.xlane.f32.xlu0 %v365_v55 }
 0x1d7   :  { %v368_v56 = vsel %vm364_vm2, %v361_v53, 0.0 }
 0x1da   :  { %369 = vadd.xlane.f32.xlu0 %v368_v56 }
 0x263   :  { %v367_v57 = vpop.xlane.xlu0 %366 }
 0x264   :  { %v372_v58 = vmul.f32 0.03125, %v367_v57 }
 0x266   :  { %v374_v59 = vsub.f32 %v358_v50, %v372_v58 }
 0x267   :  { %v370_v60 = vpop.xlane.xlu0 %369 }
 0x268   :  { %v373_v61 = vmul.f32 0.03125, %v370_v60  ;;  %v376_v62 = vmul.f32 %v374_v59, %v374_v59 }
 0x26a   :  { %v375_v63 = vsub.f32 %v361_v53, %v373_v61  ;;  %v378_v0 = vsel %vm364_vm2, %v376_v62, 0.0 }
 0x26b   :  { %379 = vadd.xlane.f32.xlu1 %v378_v0 }
 0x26c   :  { %v377_v2 = vmul.f32 %v375_v63, %v375_v63 }
 0x26e   :  { %v381_v3 = vsel %vm364_vm2, %v377_v2, 0.0 }
 0x26f   :  { %382 = vadd.xlane.f32.xlu1 %v381_v3 }
 0x2f8   :  { %v380_v6 = vpop.xlane.xlu1 %379 }
 0x2f9   :  { %v384_v7 = vmul.f32 0.03125, %v380_v6 }
 0x2fb   :  { %v386_v8 = vadd.f32 1e-05, %v384_v7 }
 0x2fc   :  { %v383_v9 = vpop.xlane.xlu1 %382 }
 0x2fd   :  { %723 = vrsqrt.f32 %v386_v8  ;;  %v385_v10 = vmul.f32 0.03125, %v383_v9 }
 0x2ff   :  { %v387_v11 = vadd.f32 1e-05, %v385_v10 }
 0x301   :  { %725 = vrsqrt.f32 %v387_v11 }
 0x307   :  { %v724_v12 = vpop.eup %723 }
 0x308   :  { %v390_v13 = vmul.f32 %v724_v12, %v374_v59 }
 0x30a   :  { %v397_v16 = vmul.f32 %v593_v14, %v390_v13 }
 0x30b   :  { %v726_v15 = vpop.eup %725 }
 0x30c   :  { %v391_v17 = vmul.f32 %v726_v15, %v375_v63  ;;  %v404_v20 = vadd.f32 %v594_v18, %v397_v16 }
 0x30e   :  { %v398_v19 = vmul.f32 %v593_v14, %v391_v17 }
 0x310   :  { %v405_v21 = vadd.f32 %v594_v18, %v398_v19 }
 0x312   :  { %v406_v22 = vpack.c.bf16 %v405_v21, %v404_v20 }
 0x314   :  { %686 = vmatmul.mubr.msk.bf16.vlgmr.msra.gmra.mrb[8].mxu0 %vm364_vm2, %v406_v22 }
 0x3e7   :  { %v465_v26 = vpop.f32.mrb[8].mxu0 }
 0x3e8   :  { %v466_v27 = vadd.f32 %v595_v25, %v465_v26  ;;  %v687_v28 = vpop.f32.mrb[9].mxu0 }
 0x3e9   :  { %v468_v29 = vpop.f32.mrb[10].mxu0 }
 0x3ea   :  { %v469_v30 = vadd.f32 %v595_v25, %v468_v29  ;;  %v688_v31 = vpop.f32.mrb[11].mxu0  ;;  %v472_v32 = vmax.f32 %v466_v27, 0.0 }
 0x3ec   :  { %v473_v33 = vmax.f32 %v469_v30, 0.0 }
 0x3ee   :  { %v474_v34 = vpack.c.bf16 %v473_v33, %v472_v32 }
 0x3f0   :  { %694 = vmatmul.mubr.msk.bf16.vlgmr.msra.gmra.mrb[8].mxu1 %vm364_vm2, %v474_v34 }
 0x4c3   :  { %v534_v35 = vpop.f32.mrb[8].mxu1 }
 0x4c4   :  { %v535_v36 = vadd.f32 %v603_v1, %v534_v35  ;;  %v695_v37 = vpop.f32.mrb[9].mxu1 }
 0x4c5   :  { %v537_v38 = vpop.f32.mrb[10].mxu1 }
 0x4c6   :  { %v538_v39 = vadd.f32 %v603_v1, %v537_v38  ;;  %543 = vrot.lane.b32.xlu0 %v535_v36, %s753_s6  ;;  %v696_v40 = vpop.f32.mrb[11].mxu1 }
 0x4c8   :  { %545 = vrot.lane.b32.xlu1 %v538_v39, %s753_s6 }
 0x538   :  { %v544_v41 = vpop.permute.xlu0 %543 }
 0x539   :  { %v549_v42 = vsel %vm364_vm2, %v404_v20, %v544_v41 }
 0x53a   :  { %v551_v43 = vsel %vm80_vm1, %v549_v42, 0.0  ;;  %v546_v44 = vpop.permute.xlu1 %545 }
 0x53b   :  { %553 = vst [vmem:[#allocation2] sm:$0xff] %v551_v43  ;;  %v550_v45 = vsel %vm364_vm2, %v405_v21, %v546_v44 }
 0x53c   :  { %v552_v46 = vsel %vm80_vm1, %v550_v45, 0.0 }
 0x53d   :  { %554 = vst [vmem:[#allocation2 + $0x8] sm:$0xff] %v552_v46 }
 0x53e   :  { %738 = shalt.err (!%p735_p4)
}
 0x53f   :  { %s739_s19 = scalar_lea.hbm %s964_s8, 256 }
 0x540   :  { %p740_p5 = scmp.ne.s32.totalorder %s964_s8, %s739_s19  ;;  %p743_p6 = scmp.lt.u32.totalorder %s739_s19, %s964_s8 }
 0x542   :  { %p745_p7 = pnand %p743_p6, %p740_p5 }
 0x544   :  { %748 = shalt.err (!%p745_p7)
}
 0x545   :  { %s755_s24 = smov 128   ;;  %s756_s5 = smov 8  }
 0x546   :  { %566 = dma.vmem_to_hbm [thread:$0]  %s561_s17, 256, %s964_s8, [#allocation3], %s755_s24, %s755_s24, %s756_s5  }
 0x547   :  { %749 = dma.done.wait [#allocation3], 256  }
 0x548   :  { %750 = vsyncadd [#allocation3], 4294967040 }
 0x549   :  { %570 = vsyncpa [#allocation3], 1 }

</bundles_post_ra>
